<compile_context>
chip_gen: v7x
topology: tpu7x:2x2x1
jax: 0.10.0
libtpu: 0.0.40
codegen_flags: <defaults>
</compile_context>

<pallas_src>
import math
import jax
import jax.numpy as jnp
from jax.experimental import pallas as pl
from jax.experimental.pallas import tpu as pltpu


def _round_up(v: int, m: int) -> int:
    return ((v + m - 1) // m) * m


def _pick_tile(dim_pad: int, desired: int, base: int) -> int:
    """Largest multiple of `base` that divides `dim_pad` and is <= desired.

    `dim_pad` must already be a multiple of `base`.  Falls back to `base`.
    """
    desired = max(desired, base)
    if dim_pad <= desired:
        return dim_pad
    best = base
    t = base
    while t <= desired:
        if dim_pad % t == 0:
            best = t
        t += base
    return best


def _sparse_matmul_kernel(x_ref, w_ref, m_ref, b_ref, o_ref):
    """Single-K-block path: one (tm, tn) output tile, no accumulator scratch."""
    w = w_ref[...] * m_ref[...].astype(w_ref.dtype)          # VPU: apply 0/1 mask
    acc = jnp.dot(x_ref[...], w, preferred_element_type=jnp.float32)  # MXU
    o_ref[...] = (acc + b_ref[...].astype(jnp.float32)).astype(o_ref.dtype)


def _sparse_matmul_acc_kernel(x_ref, w_ref, m_ref, b_ref, o_ref, acc_ref):
    """Multi-K-block path: f32 VMEM accumulator, init on k==0, finalize on last k."""
    k = pl.program_id(2)

    @pl.when(k == 0)
    def _init():
        acc_ref[...] = jnp.zeros_like(acc_ref)

    w = w_ref[...] * m_ref[...].astype(w_ref.dtype)           # VPU mask multiply
    acc_ref[...] += jnp.dot(x_ref[...], w, preferred_element_type=jnp.float32)

    @pl.when(k == pl.num_programs(2) - 1)
    def _finalize():
        o_ref[...] = (acc_ref[...] + b_ref[...].astype(jnp.float32)).astype(o_ref.dtype)


def sparse_layer_forward(x, weight, weight_mask, bias, *,
                         tm=512, tn=512, tk=1024,
                         vmem_budget_bytes=48 * 1024 * 1024):
    """y = x @ (weight * weight_mask) + bias as a tiled Pallas TPU matmul."""
    batch, indim = x.shape
    indim_w, outdim = weight.shape
    assert indim == indim_w
    assert weight_mask.shape == (indim, outdim)
    assert bias.shape == (outdim,)

    # Stream the 0/1 mask as int8 (exact, half the bytes of f32).  In a real
    # training loop this cast belongs at topology-update time, not per call.
    if weight_mask.dtype != jnp.int8:
        weight_mask = weight_mask.astype(jnp.int8)
    bias2d = bias.reshape(1, outdim)

    # 1) Pad dims only to the hardware multiples (8 sublanes / 128 lanes).
    m_pad = _round_up(batch, 8)
    n_pad = _round_up(outdim, 128)
    k_pad = _round_up(indim, 128)

    # 2) Tiles as divisors of the padded dims -> padding waste bounded to <8/<128.
    tm = _pick_tile(m_pad, tm, 8)
    tn = _pick_tile(n_pad, tn, 128)
    tk = _pick_tile(k_pad, tk, 128)

    # 3) Keep >=2 blocks along a parallel axis when possible (v7x dual TensorCore).
    if (m_pad // tm) * (n_pad // tn) < 2:
        if n_pad >= 256:
            tn = _pick_tile(n_pad, n_pad // 2, 128)
        elif m_pad >= 16:
            tm = _pick_tile(m_pad, m_pad // 2, 8)

    x_item = jnp.dtype(x.dtype).itemsize
    w_item = jnp.dtype(weight.dtype).itemsize
    o_item = x_item

    def footprint(tm_, tn_, tk_, multi_k_):
        # Double-buffered input/output tiles + (optional) resident f32 accumulator.
        b = 2 * (tm_ * tk_ * x_item          # x tile
                 + tk_ * tn_ * w_item        # weight tile
                 + tk_ * tn_ * 1             # int8 mask tile
                 + tm_ * tn_ * o_item        # output tile
                 + tn_ * 4)                  # bias tile
        if multi_k_:
            b += tm_ * tn_ * 4
        return b

    # 4) Shrink K (then N) if the footprint exceeds the v7x-safe VMEM budget.
    while footprint(tm, tn, tk, k_pad > tk) > vmem_budget_bytes:
        if tk > 128:
            new_tk = _pick_tile(k_pad, max(tk // 2, 128), 128)
            if new_tk < tk:
                tk = new_tk
                continue
        if tn > 128:
            new_tn = _pick_tile(n_pad, max(tn // 2, 128), 128)
            if new_tn < tn:
                tn = new_tn
                continue
        break

    multi_k = k_pad > tk

    # Pad operands (no-op when already aligned).  In production, store the padded
    # weight / mask / bias as the parameters so this never sits on the hot path.
    if (m_pad, k_pad) != (batch, indim):
        x = jnp.pad(x, ((0, m_pad - batch), (0, k_pad - indim)))
    if (k_pad, n_pad) != (indim, outdim):
        weight = jnp.pad(weight, ((0, k_pad - indim), (0, n_pad - outdim)))
        weight_mask = jnp.pad(weight_mask, ((0, k_pad - indim), (0, n_pad - outdim)))
    if n_pad != outdim:
        bias2d = jnp.pad(bias2d, ((0, 0), (0, n_pad - outdim)))

    m_blocks, n_blocks, k_blocks = m_pad // tm, n_pad // tn, k_pad // tk

    cost = pl.CostEstimate(
        flops=2 * batch * indim * outdim,
        transcendentals=0,
        bytes_accessed=(
            m_pad * k_pad * x_item * n_blocks          # x re-read per N block
            + k_pad * n_pad * (w_item + 1) * m_blocks  # weight + int8 mask per M block
            + n_pad * 4 * m_blocks                     # bias
            + m_pad * n_pad * o_item                   # output
        ),
    )

    vmem_limit = min(max(32 * 1024 * 1024,
                         2 * footprint(tm, tn, tk, multi_k)),
                     56 * 1024 * 1024)

    if multi_k:
        grid = (m_blocks, n_blocks, k_blocks)
        in_specs = [
            pl.BlockSpec((tm, tk), lambda i, j, k: (i, k)),   # x tile
            pl.BlockSpec((tk, tn), lambda i, j, k: (k, j)),   # weight tile
            pl.BlockSpec((tk, tn), lambda i, j, k: (k, j)),   # int8 mask tile
            pl.BlockSpec((1, tn), lambda i, j, k: (0, j)),    # bias tile
        ]
        out_specs = pl.BlockSpec((tm, tn), lambda i, j, k: (i, j))
        scratch_shapes = [pltpu.VMEM((tm, tn), jnp.float32)]
        kernel = _sparse_matmul_acc_kernel
        semantics = ("parallel", "parallel", "arbitrary")
    else:
        grid = (m_blocks, n_blocks)
        in_specs = [
            pl.BlockSpec((tm, tk), lambda i, j: (i, 0)),
            pl.BlockSpec((tk, tn), lambda i, j: (0, j)),
            pl.BlockSpec((tk, tn), lambda i, j: (0, j)),
            pl.BlockSpec((1, tn), lambda i, j: (0, j)),
        ]
        out_specs = pl.BlockSpec((tm, tn), lambda i, j: (i, j))
        scratch_shapes = []
        kernel = _sparse_matmul_kernel
        semantics = ("parallel", "parallel")

    out_padded = pl.pallas_call(
        kernel,
        out_shape=jax.ShapeDtypeStruct((m_pad, n_pad), x.dtype),
        grid_spec=pltpu.PrefetchScalarGridSpec(
            num_scalar_prefetch=0,
            grid=grid,
            in_specs=in_specs,
            out_specs=out_specs,
            scratch_shapes=scratch_shapes,
        ),
        compiler_params=pltpu.CompilerParams(
            dimension_semantics=semantics,
            vmem_limit_bytes=vmem_limit,
        ),
        cost_estimate=cost,
    )(x, weight, weight_mask, bias2d)

    # Skip the slice copy entirely when the problem was already aligned.
    if (m_pad, n_pad) != (batch, outdim):
        return out_padded[:batch, :outdim]
    return out_padded


def _make_inputs(key, batch, indim, outdim, sparsity=0.5):
    stdv = math.sqrt(2.0 / indim)  # init_mode == "kaiming"
    k_mask, k_w, k_b, k_x = jax.random.split(key, 4)

    # weight_mask = rand(indim, outdim); < sparsity -> 0 else 1   (as in __init__)
    rand_mask = jax.random.uniform(k_mask, (indim, outdim), dtype=jnp.float32)
    weight_mask = jnp.where(rand_mask < sparsity, 0.0, 1.0).astype(jnp.float32)

    # weight = randn(indim, outdim) * stdv; weight *= weight_mask  (as in __init__)
    weight = jax.random.normal(k_w, (indim, outdim), dtype=jnp.float32) * stdv
    weight = weight * weight_mask

    # bias = randn(outdim) * stdv  (args.bias == True path)
    bias = jax.random.normal(k_b, (outdim,), dtype=jnp.float32) * stdv

    x = jax.random.normal(k_x, (batch, indim), dtype=jnp.float32)
    return x, weight, weight_mask, bias


if __name__ == "__main__":
    key = jax.random.PRNGKey(0)
    k1, k2 = jax.random.split(key)

    # Case 1: small shapes, single-K fast path (no accumulator, 2-D grid).
    x, w, m, b = _make_inputs(k1, batch=8, indim=32, outdim=64)
    y = jax.block_until_ready(sparse_layer_forward(x, w, m, b))
    y_ref = x @ (w * m) + b
    assert y.shape == y_ref.shape
    assert jnp.allclose(y, y_ref, atol=1e-5, rtol=1e-5)

    # Case 2: small shapes but forced multi-K / multi-N grid, exercising the
    # accumulator kernel (pl.when init / finalize) and dual-TC-friendly grid.
    x2, w2, m2, b2 = _make_inputs(k2, batch=8, indim=256, outdim=384)
    y2 = jax.block_until_ready(
        sparse_layer_forward(x2, w2, m2, b2, tm=8, tn=128, tk=128))
    y2_ref = x2 @ (w2 * m2) + b2
    assert y2.shape == y2_ref.shape
    assert jnp.allclose(y2, y2_ref, atol=1e-5, rtol=1e-5)

    print("KERNEL_OK")
</pallas_src>

<mosaic_0001>
module attributes {stable_mosaic.version = 11 : i64} {
  func.func @_sparse_matmul_kernel(%arg0: i32, %arg1: i32, %arg2: memref<8x128xf32, #tpu.memory_space<vmem>>, %arg3: memref<128x128xf32, #tpu.memory_space<vmem>>, %arg4: memref<128x128xi8, #tpu.memory_space<vmem>>, %arg5: memref<1x128xf32, #tpu.memory_space<vmem>>, %arg6: memref<8x128xf32, #tpu.memory_space<vmem>>) attributes {dimension_semantics = [#tpu.dimension_semantics<parallel>, #tpu.dimension_semantics<parallel>], iteration_bounds = array<i64: 1, 1>, scalar_prefetch = 0 : i64, scratch_operands = 0 : i64, tpu.core_type = #tpu.core_type<tc>, window_params = [{transform_indices = @transform_0, window_bounds = array<i64: 8, 128>}, {transform_indices = @transform_1, window_bounds = array<i64: 128, 128>}, {transform_indices = @transform_2, window_bounds = array<i64: 128, 128>}, {transform_indices = @transform_3, window_bounds = array<i64: 1, 128>}, {transform_indices = @transform_4, window_bounds = array<i64: 8, 128>}]} {
    %c0 = arith.constant 0 : index
    %c0_0 = arith.constant 0 : index
    %0 = vector.load %arg3[%c0, %c0_0] : memref<128x128xf32, #tpu.memory_space<vmem>>, vector<128x128xf32>
    %c0_1 = arith.constant 0 : index
    %c0_2 = arith.constant 0 : index
    %1 = vector.load %arg4[%c0_1, %c0_2] : memref<128x128xi8, #tpu.memory_space<vmem>>, vector<128x128xi8>
    %2 = arith.sitofp %1 : vector<128x128xi8> to vector<128x128xf32>
    %3 = arith.mulf %0, %2 : vector<128x128xf32>
    %c0_3 = arith.constant 0 : index
    %c0_4 = arith.constant 0 : index
    %4 = vector.load %arg2[%c0_3, %c0_4] : memref<8x128xf32, #tpu.memory_space<vmem>>, vector<8x128xf32>
    %cst = arith.constant dense<0.000000e+00> : vector<8x128xf32>
    %5 = tpu.matmul %4, %3, %cst {dimension_numbers = #tpu.dot_dimension_numbers<[1], [0], [0], [1], [0, 0, 1, 1], [], []>} : vector<8x128xf32>, vector<128x128xf32>, vector<8x128xf32> -> vector<8x128xf32>
    %c0_5 = arith.constant 0 : index
    %c0_6 = arith.constant 0 : index
    %6 = vector.load %arg5[%c0_5, %c0_6] : memref<1x128xf32, #tpu.memory_space<vmem>>, vector<1x128xf32>
    %7 = vector.broadcast %6 : vector<1x128xf32> to vector<8x128xf32>
    %8 = arith.addf %5, %7 : vector<8x128xf32>
    %c0_7 = arith.constant 0 : index
    %c0_8 = arith.constant 0 : index
    %9 = vector.load %arg6[%c0_7, %c0_8] : memref<8x128xf32, #tpu.memory_space<vmem>>, vector<8x128xf32>
    tpu.vector_store %arg6[%c0_7, %c0_8], %8 {strides = array<i32>} : memref<8x128xf32, #tpu.memory_space<vmem>>, vector<8x128xf32>,
    return
  }
  func.func @transform_0(%arg0: i32, %arg1: i32) -> (i32, i32) {
    %c0_i32 = arith.constant 0 : i32
    %c0_i32_0 = arith.constant 0 : i32
    return %arg0, %c0_i32 : i32, i32
  }
  func.func @transform_1(%arg0: i32, %arg1: i32) -> (i32, i32) {
    %c0_i32 = arith.constant 0 : i32
    %c0_i32_0 = arith.constant 0 : i32
    return %c0_i32, %arg1 : i32, i32
  }
  func.func @transform_2(%arg0: i32, %arg1: i32) -> (i32, i32) {
    %c0_i32 = arith.constant 0 : i32
    %c0_i32_0 = arith.constant 0 : i32
    return %c0_i32, %arg1 : i32, i32
  }
  func.func @transform_3(%arg0: i32, %arg1: i32) -> (i32, i32) {
    %c0_i32 = arith.constant 0 : i32
    %c0_i32_0 = arith.constant 0 : i32
    return %c0_i32, %arg1 : i32, i32
  }
  func.func @transform_4(%arg0: i32, %arg1: i32) -> (i32, i32) {
    %c0_i32 = arith.constant 0 : i32
    return %arg0, %arg1 : i32, i32
  }
}

</mosaic_0001>

<bundles_post_ra>
// kernel: tpu_custom_call.1
= control target key start
LH: loop header
LB: loop body
LE: loop exit
PB: predicated region body
PF: predicated region fallthrough
CT: control target
= control target key end

     0   :  { %9 = vsyncpa [#allocation3], 0  ;;  %s499_s0 = inlined_call_operand.hbm [shape: f32[8,128], index: 0, kind: input, shape index: {}]   ;;  %s500_s1 = inlined_call_operand.hbm [shape: f32[128,128], index: 1, kind: input, shape index: {}]   ;;  %s501_s2 = inlined_call_operand.hbm [shape: s8[128,128], index: 2, kind: input, shape index: {}]   ;;  %s502_s3 = inlined_call_operand.vmem [shape: f32[1,128], index: 3, kind: input, shape index: {}]   ;;  %s503_s4 = inlined_call_operand.hbm [shape: f32[8,128], index: 4, kind: output, shape index: {}]  }
   0x1   :  { %10 = vsyncpa [#allocation6], 0 }
   0x2   :  { %11 = vsyncpa [#allocation4], 0  ;;  %s400_s15 = smov [#allocation5]   ;;  %s306_s19 = scalar_lea.hbm %s500_s1, 2048 }
   0x3   :  { %s27_s16 = sshll.u32 %s400_s15, 4  ;;  %p307_p0 = scmp.ne.s32.totalorder %s500_s1, %s306_s19  ;;  %s28_s16 = int_to_ptr.vmem [resolvable:$true] %s27_s16 }
   0x4   :  { %p310_p1 = scmp.lt.u32.totalorder %s306_s19, %s500_s1 }
   0x6   :  { %p312_p2 = pnand %p310_p1, %p307_p0 }
   0x8   :  { %315 = shalt.err (!%p312_p2)
}
   0x9   :  { %s316_s24 = scalar_lea.vmem %s28_s16, 2048  ;;  %p321_p4 = scmp.lt.s32.totalorder %s28_s16, %s28_s16 }
   0xa   :  { %p317_p3 = scmp.ne.s32.totalorder %s28_s16, %s316_s24  ;;  %p322_p5 = scmp.lt.s32.totalorder %s316_s24, %s316_s24 }
   0xc   :  { %p323_p6 = por %p322_p5, %p321_p4 }
   0xe   :  { %p324_p7 = pnand %p323_p6, %p317_p3 }
  0x10   :  { %327 = shalt.err (!%p324_p7)
}
  0x11   :  { %s401_s25 = smov 128   ;;  %s402_s26 = smov 8  }
  0x12   :  { %33 = dma.hbm_to_vmem [thread:$0]  %s500_s1, 2048, %s28_s16, [#allocation6], %s401_s25, %s401_s25, %s402_s26  }
  0x13   :  { %s403_s29 = smov [#allocation2]   ;;  %s404_s5 = smov [#allocation7]  }
  0x14   :  { %s18_s30 = sshll.u32 %s403_s29, 4  ;;  %s39_s6 = sshll.u32 %s404_s5, 4  ;;  %s19_s30 = int_to_ptr.vmem [resolvable:$true] %s18_s30  ;;  %s40_s6 = int_to_ptr.vmem [resolvable:$true] %s39_s6 }
  0x15   :  { %s328_s9 = scalar_lea.hbm %s499_s0, 128 }
  0x16   :  { %p329_p8 = scmp.ne.s32.totalorder %s499_s0, %s328_s9  ;;  %p332_p9 = scmp.lt.u32.totalorder %s328_s9, %s499_s0 }
  0x18   :  { %p334_p10 = pnand %p332_p9, %p329_p8 }
  0x1a   :  { %337 = shalt.err (!%p334_p10)
}
  0x1b   :  { %s338_s1 = scalar_lea.vmem %s19_s30, 128  ;;  %p343_p12 = scmp.lt.s32.totalorder %s19_s30, %s19_s30 }
  0x1c   :  { %p339_p11 = scmp.ne.s32.totalorder %s19_s30, %s338_s1  ;;  %p344_p13 = scmp.lt.s32.totalorder %s338_s1, %s338_s1 }
  0x1e   :  { %p345_p0 = por %p344_p13, %p343_p12 }
  0x20   :  { %p346_p1 = pnand %p345_p0, %p339_p11 }
  0x22   :  { %349 = shalt.err (!%p346_p1)
}
  0x23   :  { %21 = dma.hbm_to_vmem [thread:$0]  %s499_s0, 128, %s19_s30, [#allocation3]  }
  0x24   :  { %s350_s18 = scalar_lea.hbm %s501_s2, 512 }
  0x25   :  { %p351_p2 = scmp.ne.s32.totalorder %s501_s2, %s350_s18  ;;  %p354_p3 = scmp.lt.u32.totalorder %s350_s18, %s501_s2 }
  0x27   :  { %p356_p4 = pnand %p354_p3, %p351_p2 }
  0x29   :  { %359 = shalt.err (!%p356_p4)
}
  0x2a   :  { %s360_s23 = scalar_lea.vmem %s40_s6, 512  ;;  %p365_p6 = scmp.lt.s32.totalorder %s40_s6, %s40_s6 }
  0x2b   :  { %p361_p5 = scmp.ne.s32.totalorder %s40_s6, %s360_s23  ;;  %p366_p7 = scmp.lt.s32.totalorder %s360_s23, %s360_s23 }
  0x2d   :  { %p367_p8 = por %p366_p7, %p365_p6 }
  0x2f   :  { %p368_p9 = pnand %p367_p8, %p361_p5 }
  0x31   :  { %371 = shalt.err (!%p368_p9)
}
  0x32   :  { %45 = dma.hbm_to_vmem [thread:$0]  %s501_s2, 512, %s40_s6, [#allocation6], %s401_s25, %s401_s25, %s402_s26  }
  0x33   :  { %394 = dma.done.wait [#allocation3], 128  }
  0x34   :  { %395 = vsyncadd [#allocation3], 4294967168 }
  0x35   :  { %396 = dma.done.wait [#allocation6], 2560  }
  0x36   :  { %397 = vsyncadd [#allocation6], 4294964736  ;;  %v405_v0 = vmov 0.0|0.0   ;;  %vm406_vm0 = vmmov 0   ;;  %v407_v1 = vmov 0.0   ;;  %v73_v2 = vld [vmem:[#allocation7] sm:$0xff] }
  0x37   :  { %273 = vmatprep.subr.bf16.mxu0 %v405_v0  ;;  %270 = vmatprep.mubr.msk.f32.mxu0 %vm406_vm0, %v407_v1  ;;  %v57_v3 = vld [vmem:[#allocation5] sm:$0xff]  ;;  %v58_v4 = vld [vmem:[#allocation5 + $0x8] sm:$0xff]  ;;  %v77_v5 = vunpack.c.0.s8 %v73_v2  ;;  %v78_v6 = vunpack.c.1.s8 %v73_v2  ;;  %v79_v7 = vunpack.c.2.s8 %v73_v2  ;;  %v80_v8 = vunpack.c.3.s8 %v73_v2  ;;  %v59_v9 = vld [vmem:[#allocation5 + $0x10] sm:$0xff]  ;;  %s408_s26 = smov [#allocation8]  }
  0x38   :  { %v60_v10 = vld [vmem:[#allocation5 + $0x18] sm:$0xff]  ;;  %v74_v11 = vld [vmem:[#allocation7 + $0x8] sm:$0xff]  ;;  %v75_v24 = vld [vmem:[#allocation7 + $0x10] sm:$0xff]  ;;  %s210_s27 = sshll.u32 %s408_s26, 4  ;;  %s211_s27 = int_to_ptr.vmem [resolvable:$true] %s210_s27 }
  0x39   :  { %v93_v12 = vcvt.s32.f32 %v77_v5  ;;  %v94_v13 = vcvt.s32.f32 %v78_v6  ;;  %v95_v14 = vcvt.s32.f32 %v79_v7  ;;  %v96_v15 = vcvt.s32.f32 %v80_v8  ;;  %v61_v25 = vld [vmem:[#allocation5 + $0x20] sm:$0xff]  ;;  %v62_v26 = vld [vmem:[#allocation5 + $0x28] sm:$0xff]  ;;  %v63_v36 = vld [vmem:[#allocation5 + $0x30] sm:$0xff]  ;;  %s372_s28 = scalar_lea.vmem %s211_s27, 128  ;;  %p377_p11 = scmp.lt.s32.totalorder %s211_s27, %s211_s27 }
  0x3a   :  { %v81_v16 = vunpack.c.0.s8 %v74_v11  ;;  %v82_v17 = vunpack.c.1.s8 %v74_v11  ;;  %v83_v18 = vunpack.c.2.s8 %v74_v11  ;;  %v84_v19 = vunpack.c.3.s8 %v74_v11  ;;  %v64_v37 = vld [vmem:[#allocation5 + $0x38] sm:$0xff]  ;;  %v65_v47 = vld [vmem:[#allocation5 + $0x40] sm:$0xff]  ;;  %v66_v48 = vld [vmem:[#allocation5 + $0x48] sm:$0xff]  ;;  %p373_p10 = scmp.ne.s32.totalorder %s211_s27, %s372_s28  ;;  %p378_p12 = scmp.lt.s32.totalorder %s372_s28, %s372_s28 }
  0x3b   :  { %v109_v20 = vmul.f32 %v93_v12, %v57_v3  ;;  %v110_v21 = vmul.f32 %v94_v13, %v58_v4  ;;  %v111_v22 = vmul.f32 %v95_v14, %v59_v9  ;;  %v112_v23 = vmul.f32 %v96_v15, %v60_v10  ;;  %v76_v46 = vld [vmem:[#allocation7 + $0x18] sm:$0xff]  ;;  %v67_v56 = vld [vmem:[#allocation5 + $0x50] sm:$0xff]  ;;  %v69_v1 = vld [vmem:[#allocation5 + $0x60] sm:$0xff] }
  0x3c   :  { %v97_v27 = vcvt.s32.f32 %v81_v16  ;;  %v98_v28 = vcvt.s32.f32 %v82_v17  ;;  %v99_v30 = vcvt.s32.f32 %v83_v18  ;;  %v100_v31 = vcvt.s32.f32 %v84_v19  ;;  %v68_v57 = vld [vmem:[#allocation5 + $0x58] sm:$0xff]  ;;  %v70_v3 = vld [vmem:[#allocation5 + $0x68] sm:$0xff]  ;;  %v71_v9 = vld [vmem:[#allocation5 + $0x70] sm:$0xff]  ;;  %p379_p13 = por %p378_p12, %p377_p11 }
  0x3d   :  { %v274_v29 = vpack.c.bf16 %v110_v21, %v109_v20  ;;  %v85_v32 = vunpack.c.0.s8 %v75_v24  ;;  %v277_v33 = vpack.c.bf16 %v112_v23, %v111_v22  ;;  %v86_v38 = vunpack.c.1.s8 %v75_v24  ;;  %v72_v10 = vld [vmem:[#allocation5 + $0x78] sm:$0xff] }
  0x3e   :  { %v113_v34 = vmul.f32 %v97_v27, %v61_v25  ;;  %v114_v35 = vmul.f32 %v98_v28, %v62_v26  ;;  %v115_v39 = vmul.f32 %v99_v30, %v63_v36  ;;  %v116_v40 = vmul.f32 %v100_v31, %v64_v37  ;;  %v125_v15 = vld [vmem:[#allocation2] sm:$0xff]  ;;  %p380_p0 = pnand %p379_p13, %p373_p10 }
  0x3f   :  { %275 = vmatpush3.bf16.msra.mxu0 %v274_v29  ;;  %v101_v41 = vcvt.s32.f32 %v85_v32  ;;  %v102_v43 = vcvt.s32.f32 %v86_v38  ;;  %v87_v44 = vunpack.c.2.s8 %v75_v24  ;;  %v88_v45 = vunpack.c.3.s8 %v75_v24  ;;  %v220_v16 = vld [vmem:[%s502_s3] ss:$0 sm:$0xff] }
  0x40   :  { %276 = vmatprep.subr.bf16.mxu0 %v405_v0  ;;  %v280_v42 = vpack.c.bf16 %v114_v35, %v113_v34  ;;  %v283_v49 = vpack.c.bf16 %v116_v40, %v115_v39  ;;  %v89_v50 = vunpack.c.0.s8 %v76_v46  ;;  %v90_v51 = vunpack.c.1.s8 %v76_v46 }
  0x41   :  { %v117_v52 = vmul.f32 %v101_v41, %v65_v47  ;;  %v118_v53 = vmul.f32 %v102_v43, %v66_v48  ;;  %v103_v54 = vcvt.s32.f32 %v87_v44  ;;  %v104_v55 = vcvt.s32.f32 %v88_v45 }
  0x42   :  { %v105_v58 = vcvt.s32.f32 %v89_v50  ;;  %v106_v59 = vcvt.s32.f32 %v90_v51  ;;  %v91_v60 = vunpack.c.2.s8 %v76_v46  ;;  %v92_v2 = vunpack.c.3.s8 %v76_v46 }
  0x43   :  { %278 = vmatpush3.bf16.msra.mxu0 %v277_v33  ;;  %v286_v61 = vpack.c.bf16 %v118_v53, %v117_v52  ;;  %v119_v62 = vmul.f32 %v103_v54, %v67_v56  ;;  %v120_v63 = vmul.f32 %v104_v55, %v68_v57 }
  0x44   :  { %279 = vmatprep.subr.bf16.mxu0 %v405_v0  ;;  %v121_v4 = vmul.f32 %v105_v58, %v69_v1  ;;  %v122_v6 = vmul.f32 %v106_v59, %v70_v3  ;;  %v107_v7 = vcvt.s32.f32 %v91_v60  ;;  %v108_v8 = vcvt.s32.f32 %v92_v2 }
  0x45   :  { %v289_v5 = vpack.c.bf16 %v120_v63, %v119_v62 }
  0x46   :  { %v292_v11 = vpack.c.bf16 %v122_v6, %v121_v4  ;;  %v123_v12 = vmul.f32 %v107_v7, %v71_v9  ;;  %v124_v13 = vmul.f32 %v108_v8, %v72_v10 }
  0x47   :  { %281 = vmatpush3.bf16.msra.mxu0 %v280_v42 }
  0x48   :  { %282 = vmatprep.subr.bf16.mxu0 %v405_v0  ;;  %v295_v14 = vpack.c.bf16 %v124_v13, %v123_v12 }
  0x4b   :  { %284 = vmatpush3.bf16.msra.mxu0 %v283_v49 }
  0x4c   :  { %285 = vmatprep.subr.bf16.mxu0 %v405_v0 }
  0x4f   :  { %287 = vmatpush3.bf16.msra.mxu0 %v286_v61 }
  0x50   :  { %288 = vmatprep.subr.bf16.mxu0 %v405_v0 }
  0x53   :  { %290 = vmatpush3.bf16.msra.mxu0 %v289_v5 }
  0x54   :  { %291 = vmatprep.subr.bf16.mxu0 %v405_v0 }
  0x57   :  { %293 = vmatpush3.bf16.msra.mxu0 %v292_v11 }
  0x58   :  { %294 = vmatprep.subr.bf16.mxu0 %v405_v0 }
  0x5b   :  { %296 = vmatpush3.bf16.msra.mxu0 %v295_v14 }
  0x5e   :  { %271 = vmatmul.mubr.f32.vlgmr.msra.gmra.mrb[0].mxu0 %v125_v15 }
 0x131   :  { %v199_v17 = vpop.f32.mrb[0].mxu0 }
 0x132   :  { %v200_v18 = vadd.f32 %v220_v16, %v199_v17  ;;  %v272_v19 = vpop.f32.mrb[1].mxu0 }
 0x134   :  { %203 = vst [vmem:[#allocation8] sm:$0xff] %v200_v18 }
 0x135   :  { %383 = shalt.err (!%p380_p0)
}
 0x136   :  { %s384_s5 = scalar_lea.hbm %s503_s4, 128 }
 0x137   :  { %p385_p1 = scmp.ne.s32.totalorder %s503_s4, %s384_s5  ;;  %p388_p2 = scmp.lt.u32.totalorder %s384_s5, %s503_s4 }
 0x139   :  { %p390_p3 = pnand %p388_p2, %p385_p1 }
 0x13b   :  { %393 = shalt.err (!%p390_p3)
}
 0x13c   :  { %213 = dma.vmem_to_hbm [thread:$0]  %s211_s27, 128, %s503_s4, [#allocation4]  }
 0x13d   :  { %398 = dma.done.wait [#allocation4], 128  }
 0x13e   :  { %399 = vsyncadd [#allocation4], 4294967168 }
 0x13f   :  { %217 = vsyncpa [#allocation3], 1 }
 0x140   :  { %218 = vsyncpa [#allocation6], 1 }
 0x141   :  { %219 = vsyncpa [#allocation4], 1 }

</bundles_post_ra>
